<compile_context>
chip_gen: v7x
topology: tpu7x:2x2x1
jax: 0.10.0
libtpu: 0.0.40
codegen_flags: <defaults>
</compile_context>

<pallas_src>
import functools

import jax
import jax.numpy as jnp
from jax import lax
from jax.experimental import pallas as pl
from jax.experimental.pallas import tpu as pltpu

_LANE = 128


def _bmae_kernel(pred_ref, y_ref, out_ref, acc_ref, *, rows, tile_rows,
                 tiles_per_part):
    """One (tile_rows, 128) tile: weighted |y - pred|, accumulated per vreg."""
    p = pl.program_id(0)   # part (core-parallel on v7x)
    i = pl.program_id(1)   # sequential tile within the part

    @pl.when(i == 0)
    def _():
        acc_ref[...] = jnp.zeros_like(acc_ref)

    # Upcast in-kernel; HBM traffic stays in the input's native dtype.
    y = y_ref[...].astype(jnp.float32)
    pr = pred_ref[...].astype(jnp.float32)

    # Piecewise weight matching BMAEloss (y == 30 exactly -> 0, NaN -> 0).
    w = jnp.where(y < 2.0, 1.0,
        jnp.where(y < 5.0, 2.0,
        jnp.where(y < 10.0, 5.0,
        jnp.where(y < 30.0, 10.0,
        jnp.where(y > 30.0, 30.0, 0.0)))))
    term = w * jnp.abs(y - pr)

    def accum(v):
        if tile_rows % 8 == 0:
            # Pure vreg-wise VPU adds: sum groups of 8 sublanes into the
            # (8, 128) accumulator; no cross-sublane XLU reduce in the loop.
            acc_ref[...] += v.reshape(-1, 8, _LANE).sum(axis=0)
        else:
            # Rare full-extent block whose row count isn't a multiple of 8.
            acc_ref[0:1, :] += jnp.sum(v, axis=0, keepdims=True)

    # Masking is only needed for the partial tail tile of each part and for
    # fully out-of-range (clamped-DMA) tiles; gate it so the common full tile
    # pays zero extra VALU work.
    t = p * tiles_per_part + i          # unclamped global tile index
    tile_start = t * tile_rows
    needs_mask = tile_start + tile_rows > rows

    @pl.when(jnp.logical_not(needs_mask))
    def _():
        accum(term)

    @pl.when(needs_mask)
    def _():
        row_ids = tile_start + lax.broadcasted_iota(jnp.int32, (tile_rows, 1), 0)
        accum(jnp.where(row_ids < rows, term, 0.0))

    @pl.when(i == tiles_per_part - 1)
    def _():
        out_ref[...] = acc_ref[...].reshape(1, 8, _LANE)


def bmae_loss(pred, y, *, tile_rows=4096, num_parts=1):
    """Scalar loss matching BMAEloss.forward(pred, y).

    num_parts=1 for single-TensorCore chips (v5e/v6e); use num_parts=2 on v7x
    so both TensorCores stream HBM via the "parallel" leading grid axis.
    """
    assert pred.shape == y.shape
    assert pred.dtype == y.dtype
    pred = pred.reshape(-1)
    y = y.reshape(-1)
    n = pred.shape[0]
    assert n > 0

    itemsize = jnp.dtype(pred.dtype).itemsize
    # Sublane-packing multiple for the streamed dtype: f32 -> 8, bf16 -> 16.
    sub = 8 * max(1, 4 // itemsize)

    # Only pad up to the 128-lane boundary (rare for conv feature maps).
    # Padding pred and y identically keeps |y - pred| == 0 there (w stays
    # finite), so padded elements contribute 0.
    # TODO(synk): element-granularity tail masking on the unpadded data would
    # avoid this copy when n % 128 != 0; not needed for typical NCHW sizes.
    pad = (-n) % _LANE
    if pad:
        pred = jnp.pad(pred, (0, pad))
        y = jnp.pad(y, (0, pad))

    rows = (n + pad) // _LANE
    pred2 = pred.reshape(rows, _LANE)
    y2 = y.reshape(rows, _LANE)

    # Block second-to-last dim must be a multiple of the sublane packing or
    # equal the full dim.
    if rows <= tile_rows:
        tile_rows = rows                      # single full-extent block
    else:
        tile_rows = max(sub, (tile_rows // sub) * sub)

    num_tiles = pl.cdiv(rows, tile_rows)
    num_parts = max(1, min(num_parts, num_tiles))
    tiles_per_part = pl.cdiv(num_tiles, num_parts)

    def in_map(p, i):
        # Clamp so a fully out-of-range tile still DMAs a valid block; it is
        # zeroed inside the kernel via its unclamped global tile index.
        t = p * tiles_per_part + i
        return (jnp.minimum(t, num_tiles - 1), 0)

    kernel = functools.partial(
        _bmae_kernel, rows=rows, tile_rows=tile_rows,
        tiles_per_part=tiles_per_part)

    out = pl.pallas_call(
        kernel,
        out_shape=jax.ShapeDtypeStruct((num_parts, 8, _LANE), jnp.float32),
        grid_spec=pltpu.PrefetchScalarGridSpec(
            num_scalar_prefetch=0,
            grid=(num_parts, tiles_per_part),
            in_specs=[
                pl.BlockSpec((tile_rows, _LANE), in_map),
                pl.BlockSpec((tile_rows, _LANE), in_map),
            ],
            out_specs=pl.BlockSpec((1, 8, _LANE), lambda p, i: (p, 0, 0)),
            scratch_shapes=[pltpu.VMEM((8, _LANE), jnp.float32)],
        ),
        compiler_params=pltpu.CompilerParams(
            dimension_semantics=("parallel", "arbitrary"),
        ),
        cost_estimate=pl.CostEstimate(
            flops=15 * n,
            transcendentals=0,
            bytes_accessed=2 * n * itemsize + num_parts * 8 * _LANE * 4,
        ),
    )(pred2, y2)

    # Tiny final reduction over (num_parts, 8, 128) per-part/per-vreg partials.
    return jnp.sum(out)


def _reference(pred, y):
    """Pure-JAX reference mirroring the PyTorch module."""
    y = y.astype(jnp.float32)
    pred = pred.astype(jnp.float32)
    w = jnp.where(y < 2.0, 1.0,
        jnp.where(y < 5.0, 2.0,
        jnp.where(y < 10.0, 5.0,
        jnp.where(y < 30.0, 10.0,
        jnp.where(y > 30.0, 30.0, 0.0)))))
    return jnp.sum(w * jnp.abs(y - pred))


if __name__ == "__main__":
    key = jax.random.PRNGKey(0)
    k1, k2, k3, k4 = jax.random.split(key, 4)

    # Primary small NCHW example (batch=2, channels=4, spatial=16x16).
    # Values span every mask bucket (y<2, [2,5), [5,10), [10,30), >30).
    shape = (2, 4, 16, 16)
    y = jax.random.uniform(k1, shape, jnp.float32, 0.0, 40.0)
    pred = jax.random.uniform(k2, shape, jnp.float32, 0.0, 40.0)
    loss = jax.block_until_ready(bmae_loss(pred, y))
    ref = jax.block_until_ready(_reference(pred, y))
    assert jnp.allclose(loss, ref, rtol=1e-5, atol=1e-2), (loss, ref)

    # Multi-tile / two-part / masked-tail / clamped-OOB-tile paths with a
    # deliberately tiny tile_rows (20 rows -> 3 tiles over a 2-part grid).
    shape2 = (2, 4, 16, 20)
    y2 = jax.random.uniform(k3, shape2, jnp.float32, 0.0, 40.0)
    p2 = jax.random.uniform(k4, shape2, jnp.float32, 0.0, 40.0)
    loss2a = jax.block_until_ready(bmae_loss(p2, y2, tile_rows=8))
    loss2b = jax.block_until_ready(bmae_loss(p2, y2, tile_rows=8, num_parts=2))
    ref2 = jax.block_until_ready(_reference(p2, y2))
    assert jnp.allclose(loss2a, ref2, rtol=1e-5, atol=1e-2), (loss2a, ref2)
    assert jnp.allclose(loss2b, ref2, rtol=1e-5, atol=1e-2), (loss2b, ref2)

    # Native bf16 inputs: streamed as bf16 (half the HBM bytes), upcast
    # in-kernel; reference sees the same bf16-rounded values.
    y3 = y.astype(jnp.bfloat16)
    p3 = pred.astype(jnp.bfloat16)
    loss3 = jax.block_until_ready(bmae_loss(p3, y3))
    ref3 = jax.block_until_ready(_reference(p3, y3))
    assert jnp.allclose(loss3, ref3, rtol=1e-4, atol=1e-1), (loss3, ref3)

    print("KERNEL_OK")
</pallas_src>

<mosaic_0001>
module attributes {stable_mosaic.version = 11 : i64} {
  func.func @_bmae_kernel(%arg0: i32, %arg1: i32, %arg2: memref<16x128xf32, #tpu.memory_space<vmem>>, %arg3: memref<16x128xf32, #tpu.memory_space<vmem>>, %arg4: memref<1x8x128xf32, #tpu.memory_space<vmem>>, %arg5: memref<8x128xf32, #tpu.memory_space<vmem>>) attributes {dimension_semantics = [#tpu.dimension_semantics<parallel>, #tpu.dimension_semantics<arbitrary>], iteration_bounds = array<i64: 1, 1>, scalar_prefetch = 0 : i64, scratch_operands = 1 : i64, tpu.core_type = #tpu.core_type<tc>, window_params = [{transform_indices = @transform_0, window_bounds = array<i64: 16, 128>}, {transform_indices = @transform_1, window_bounds = array<i64: 16, 128>}, {transform_indices = @transform_2, window_bounds = array<i64: 1, 8, 128>}]} {
    %c0_i32 = arith.constant 0 : i32
    %0 = arith.cmpi eq, %arg1, %c0_i32 : i32
    %1 = arith.extui %0 : i1 to i32
    %c0_i32_0 = arith.constant 0 : i32
    %2 = arith.cmpi ne, %1, %c0_i32_0 : i32
    scf.if %2 {
      %cst_20 = arith.constant 0.000000e+00 : f32
      %42 = vector.broadcast %cst_20 : f32 to vector<8x128xf32>
      %c0_21 = arith.constant 0 : index
      %c0_22 = arith.constant 0 : index
      %43 = vector.load %arg5[%c0_21, %c0_22] : memref<8x128xf32, #tpu.memory_space<vmem>>, vector<8x128xf32>
      tpu.vector_store %arg5[%c0_21, %c0_22], %42 {strides = array<i32>} : memref<8x128xf32, #tpu.memory_space<vmem>>, vector<8x128xf32>,
    } else {
    }
    %c0 = arith.constant 0 : index
    %c0_1 = arith.constant 0 : index
    %3 = vector.load %arg3[%c0, %c0_1] : memref<16x128xf32, #tpu.memory_space<vmem>>, vector<16x128xf32>
    %c0_2 = arith.constant 0 : index
    %c0_3 = arith.constant 0 : index
    %4 = vector.load %arg2[%c0_2, %c0_3] : memref<16x128xf32, #tpu.memory_space<vmem>>, vector<16x128xf32>
    %cst = arith.constant 2.000000e+00 : f32
    %5 = vector.broadcast %cst : f32 to vector<16x128xf32>
    %6 = arith.cmpf olt, %3, %5 : vector<16x128xf32>
    %cst_4 = arith.constant 5.000000e+00 : f32
    %7 = vector.broadcast %cst_4 : f32 to vector<16x128xf32>
    %8 = arith.cmpf olt, %3, %7 : vector<16x128xf32>
    %cst_5 = arith.constant 1.000000e+01 : f32
    %9 = vector.broadcast %cst_5 : f32 to vector<16x128xf32>
    %10 = arith.cmpf olt, %3, %9 : vector<16x128xf32>
    %cst_6 = arith.constant 3.000000e+01 : f32
    %11 = vector.broadcast %cst_6 : f32 to vector<16x128xf32>
    %12 = arith.cmpf olt, %3, %11 : vector<16x128xf32>
    %cst_7 = arith.constant 3.000000e+01 : f32
    %13 = vector.broadcast %cst_7 : f32 to vector<16x128xf32>
    %14 = arith.cmpf ogt, %3, %13 : vector<16x128xf32>
    %cst_8 = arith.constant 3.000000e+01 : f32
    %cst_9 = arith.constant 0.000000e+00 : f32
    %15 = vector.broadcast %cst_8 : f32 to vector<16x128xf32>
    %16 = vector.broadcast %cst_9 : f32 to vector<16x128xf32>
    %17 = arith.select %14, %15, %16 : vector<16x128xi1>, vector<16x128xf32>
    %cst_10 = arith.constant 1.000000e+01 : f32
    %18 = vector.broadcast %cst_10 : f32 to vector<16x128xf32>
    %19 = arith.select %12, %18, %17 : vector<16x128xi1>, vector<16x128xf32>
    %cst_11 = arith.constant 5.000000e+00 : f32
    %20 = vector.broadcast %cst_11 : f32 to vector<16x128xf32>
    %21 = arith.select %10, %20, %19 : vector<16x128xi1>, vector<16x128xf32>
    %cst_12 = arith.constant 2.000000e+00 : f32
    %22 = vector.broadcast %cst_12 : f32 to vector<16x128xf32>
    %23 = arith.select %8, %22, %21 : vector<16x128xi1>, vector<16x128xf32>
    %cst_13 = arith.constant 1.000000e+00 : f32
    %24 = vector.broadcast %cst_13 : f32 to vector<16x128xf32>
    %25 = arith.select %6, %24, %23 : vector<16x128xi1>, vector<16x128xf32>
    %26 = arith.subf %3, %4 : vector<16x128xf32>
    %27 = math.absf %26 : vector<16x128xf32>
    %28 = arith.mulf %25, %27 : vector<16x128xf32>
    %c1_i32 = arith.constant 1 : i32
    %29 = arith.muli %arg0, %c1_i32 : i32
    %30 = arith.addi %29, %arg1 : i32
    %c16_i32 = arith.constant 16 : i32
    %31 = arith.muli %30, %c16_i32 : i32
    %c16_i32_14 = arith.constant 16 : i32
    %32 = arith.addi %31, %c16_i32_14 : i32
    %c16_i32_15 = arith.constant 16 : i32
    %33 = arith.cmpi sgt, %32, %c16_i32_15 : i32
    %true = arith.constant true
    %34 = arith.xori %33, %true : i1
    %35 = arith.extui %34 : i1 to i32
    %c0_i32_16 = arith.constant 0 : i32
    %36 = arith.cmpi ne, %35, %c0_i32_16 : i32
    scf.if %36 {
      %c0_20 = arith.constant 0 : index
      %c0_21 = arith.constant 0 : index
      %42 = vector.load %arg5[%c0_20, %c0_21] : memref<8x128xf32, #tpu.memory_space<vmem>>, vector<8x128xf32>
      %43 = vector.shape_cast %28 : vector<16x128xf32> to vector<2x8x128xf32>
      %cst_22 = arith.constant dense<0.000000e+00> : vector<8x128xf32>
      %44 = vector.multi_reduction <add>, %43, %cst_22 [0] : vector<2x8x128xf32> to vector<8x128xf32>
      %45 = arith.addf %42, %44 : vector<8x128xf32>
      %c0_23 = arith.constant 0 : index
      %c0_24 = arith.constant 0 : index
      %46 = vector.load %arg5[%c0_23, %c0_24] : memref<8x128xf32, #tpu.memory_space<vmem>>, vector<8x128xf32>
      tpu.vector_store %arg5[%c0_23, %c0_24], %45 {strides = array<i32>} : memref<8x128xf32, #tpu.memory_space<vmem>>, vector<8x128xf32>,
    } else {
    }
    %37 = arith.extui %33 : i1 to i32
    %c0_i32_17 = arith.constant 0 : i32
    %38 = arith.cmpi ne, %37, %c0_i32_17 : i32
    scf.if %38 {
      %42 = tpu.iota {dimensions = array<i32: 0>} : vector<16x1xi32>
      %43 = vector.broadcast %31 : i32 to vector<16x1xi32>
      %44 = arith.addi %43, %42 : vector<16x1xi32>
      %c16_i32_20 = arith.constant 16 : i32
      %45 = vector.broadcast %c16_i32_20 : i32 to vector<16x1xi32>
      %46 = arith.cmpi slt, %44, %45 : vector<16x1xi32>
      %cst_21 = arith.constant 0.000000e+00 : f32
      %47 = vector.shape_cast %46 : vector<16x1xi1> to vector<16x1xi1>
      %48 = vector.broadcast %47 : vector<16x1xi1> to vector<16x128xi1>
      %49 = vector.broadcast %cst_21 : f32 to vector<16x128xf32>
      %50 = arith.select %48, %28, %49 : vector<16x128xi1>, vector<16x128xf32>
      %c0_22 = arith.constant 0 : index
      %c0_23 = arith.constant 0 : index
      %51 = vector.load %arg5[%c0_22, %c0_23] : memref<8x128xf32, #tpu.memory_space<vmem>>, vector<8x128xf32>
      %52 = vector.shape_cast %50 : vector<16x128xf32> to vector<2x8x128xf32>
      %cst_24 = arith.constant dense<0.000000e+00> : vector<8x128xf32>
      %53 = vector.multi_reduction <add>, %52, %cst_24 [0] : vector<2x8x128xf32> to vector<8x128xf32>
      %54 = arith.addf %51, %53 : vector<8x128xf32>
      %c0_25 = arith.constant 0 : index
      %c0_26 = arith.constant 0 : index
      %55 = vector.load %arg5[%c0_25, %c0_26] : memref<8x128xf32, #tpu.memory_space<vmem>>, vector<8x128xf32>
      tpu.vector_store %arg5[%c0_25, %c0_26], %54 {strides = array<i32>} : memref<8x128xf32, #tpu.memory_space<vmem>>, vector<8x128xf32>,
    } else {
    }
    %c0_i32_18 = arith.constant 0 : i32
    %39 = arith.cmpi eq, %arg1, %c0_i32_18 : i32
    %40 = arith.extui %39 : i1 to i32
    %c0_i32_19 = arith.constant 0 : i32
    %41 = arith.cmpi ne, %40, %c0_i32_19 : i32
    scf.if %41 {
      %c0_20 = arith.constant 0 : index
      %c0_21 = arith.constant 0 : index
      %42 = vector.load %arg5[%c0_20, %c0_21] : memref<8x128xf32, #tpu.memory_space<vmem>>, vector<8x128xf32>
      %43 = vector.shape_cast %42 : vector<8x128xf32> to vector<1x8x128xf32>
      %c0_22 = arith.constant 0 : index
      %c0_23 = arith.constant 0 : index
      %c0_24 = arith.constant 0 : index
      %44 = vector.load %arg4[%c0_22, %c0_23, %c0_24] : memref<1x8x128xf32, #tpu.memory_space<vmem>>, vector<1x8x128xf32>
      tpu.vector_store %arg4[%c0_22, %c0_23, %c0_24], %43 {strides = array<i32>} : memref<1x8x128xf32, #tpu.memory_space<vmem>>, vector<1x8x128xf32>,
    } else {
    }
    return
  }
  func.func @transform_0(%arg0: i32, %arg1: i32) -> (i32, i32) {
    %c1_i32 = arith.constant 1 : i32
    %0 = arith.muli %arg0, %c1_i32 : i32
    %1 = arith.addi %0, %arg1 : i32
    %c0_i32 = arith.constant 0 : i32
    %2 = arith.minsi %1, %c0_i32 : i32
    %c0_i32_0 = arith.constant 0 : i32
    %c0_i32_1 = arith.constant 0 : i32
    return %2, %c0_i32_0 : i32, i32
  }
  func.func @transform_1(%arg0: i32, %arg1: i32) -> (i32, i32) {
    %c1_i32 = arith.constant 1 : i32
    %0 = arith.muli %arg0, %c1_i32 : i32
    %1 = arith.addi %0, %arg1 : i32
    %c0_i32 = arith.constant 0 : i32
    %2 = arith.minsi %1, %c0_i32 : i32
    %c0_i32_0 = arith.constant 0 : i32
    %c0_i32_1 = arith.constant 0 : i32
    return %2, %c0_i32_0 : i32, i32
  }
  func.func @transform_2(%arg0: i32, %arg1: i32) -> (i32, i32, i32) {
    %c0_i32 = arith.constant 0 : i32
    %c0_i32_0 = arith.constant 0 : i32
    %c0_i32_1 = arith.constant 0 : i32
    return %arg0, %c0_i32, %c0_i32_0 : i32, i32, i32
  }
}

</mosaic_0001>

<bundles_post_ra>
// kernel: tpu_custom_call.1
= control target key start
LH: loop header
LB: loop body
LE: loop exit
PB: predicated region body
PF: predicated region fallthrough
CT: control target
= control target key end

     0   :  { %7 = vsyncpa [#allocation4], 0  ;;  %s292_s0 = inlined_call_operand.hbm [shape: f32[16,128], index: 0, kind: input, shape index: {}]   ;;  %s293_s1 = inlined_call_operand.hbm [shape: f32[16,128], index: 1, kind: input, shape index: {}]   ;;  %s294_s2 = inlined_call_operand.hbm [shape: f32[1,8,128], index: 2, kind: output, shape index: {}]  }
   0x1   :  { %8 = vsyncpa [#allocation7], 0 }
   0x2   :  { %9 = vsyncpa [#allocation5], 0  ;;  %s231_s9 = smov [#allocation3]   ;;  %s159_s13 = scalar_lea.hbm %s292_s0, 256 }
   0x3   :  { %s21_s10 = sshll.u32 %s231_s9, 4  ;;  %p160_p0 = scmp.ne.s32.totalorder %s292_s0, %s159_s13  ;;  %s22_s10 = int_to_ptr.vmem [resolvable:$true] %s21_s10 }
   0x4   :  { %p163_p1 = scmp.lt.u32.totalorder %s159_s13, %s292_s0 }
   0x6   :  { %p165_p2 = pnand %p163_p1, %p160_p0 }
   0x8   :  { %168 = shalt.err (!%p165_p2)
}
   0x9   :  { %s169_s18 = scalar_lea.vmem %s22_s10, 256  ;;  %p174_p4 = scmp.lt.s32.totalorder %s22_s10, %s22_s10 }
   0xa   :  { %p170_p3 = scmp.ne.s32.totalorder %s22_s10, %s169_s18  ;;  %p175_p5 = scmp.lt.s32.totalorder %s169_s18, %s169_s18 }
   0xc   :  { %p176_p6 = por %p175_p5, %p174_p4 }
   0xe   :  { %p177_p7 = pnand %p176_p6, %p170_p3 }
  0x10   :  { %180 = shalt.err (!%p177_p7)
}
  0x11   :  { %s232_s19 = smov 128   ;;  %s233_s20 = smov 8  }
  0x12   :  { %27 = dma.hbm_to_vmem [thread:$0]  %s292_s0, 256, %s22_s10, [#allocation4], %s232_s19, %s232_s19, %s233_s20  }
  0x13   :  { %s234_s23 = smov [#allocation6]   ;;  %s181_s27 = scalar_lea.hbm %s293_s1, 256 }
  0x14   :  { %s39_s24 = sshll.u32 %s234_s23, 4  ;;  %p182_p8 = scmp.ne.s32.totalorder %s293_s1, %s181_s27  ;;  %s40_s24 = int_to_ptr.vmem [resolvable:$true] %s39_s24 }
  0x15   :  { %p185_p9 = scmp.lt.u32.totalorder %s181_s27, %s293_s1 }
  0x17   :  { %p187_p10 = pnand %p185_p9, %p182_p8 }
  0x19   :  { %190 = shalt.err (!%p187_p10)
}
  0x1a   :  { %s191_s4 = scalar_lea.vmem %s40_s24, 256  ;;  %p196_p12 = scmp.lt.s32.totalorder %s40_s24, %s40_s24 }
  0x1b   :  { %p192_p11 = scmp.ne.s32.totalorder %s40_s24, %s191_s4  ;;  %p197_p13 = scmp.lt.s32.totalorder %s191_s4, %s191_s4 }
  0x1d   :  { %p198_p0 = por %p197_p13, %p196_p12 }
  0x1f   :  { %p199_p1 = pnand %p198_p0, %p192_p11 }
  0x21   :  { %202 = shalt.err (!%p199_p1)
}
  0x22   :  { %45 = dma.hbm_to_vmem [thread:$0]  %s293_s1, 256, %s40_s24, [#allocation7], %s232_s19, %s232_s19, %s233_s20  }
  0x23   :  { %225 = dma.done.wait [#allocation4], 256  }
  0x24   :  { %226 = vsyncadd [#allocation4], 4294967040 }
  0x25   :  { %227 = dma.done.wait [#allocation7], 256  }
  0x26   :  { %228 = vsyncadd [#allocation7], 4294967040  ;;  %v65_v0 = vld [vmem:[#allocation6] sm:$0xff]  ;;  %v66_v1 = vld [vmem:[#allocation6 + $0x8] sm:$0xff]  ;;  %v235_v6 = vmov 0.0   ;;  %s236_s1 = smov [#allocation8]  }
  0x27   :  { %v67_v2 = vld [vmem:[#allocation3] sm:$0xff]  ;;  %v68_v3 = vld [vmem:[#allocation3 + $0x8] sm:$0xff]  ;;  %vm69_vm0 = vcmp.lt.f32.partialorder %v65_v0, 2.0  ;;  %vm70_vm1 = vcmp.lt.f32.partialorder %v66_v1, 2.0  ;;  %vm73_vm2 = vcmp.lt.f32.partialorder %v65_v0, 10.0  ;;  %vm74_vm3 = vcmp.lt.f32.partialorder %v66_v1, 10.0 }
  0x28   :  { %vm75_vm4 = vcmp.lt.f32.partialorder %v65_v0, 30.0  ;;  %vm76_vm5 = vcmp.lt.f32.partialorder %v66_v1, 30.0  ;;  %vm77_vm6 = vcmp.gt.f32.partialorder %v65_v0, 30.0  ;;  %vm78_vm7 = vcmp.gt.f32.partialorder %v66_v1, 30.0  ;;  %s139_s6 = sshll.u32 %s236_s1, 4  ;;  %s140_s6 = int_to_ptr.vmem [resolvable:$true] %s139_s6 }
  0x29   :  { %v89_v4 = vsub.f32 %v65_v0, %v67_v2  ;;  %v90_v5 = vsub.f32 %v66_v1, %v68_v3  ;;  %vm71_vm8 = vcmp.lt.f32.partialorder %v65_v0, 5.0  ;;  %vm72_vm9 = vcmp.lt.f32.partialorder %v66_v1, 5.0  ;;  %s203_s7 = scalar_lea.vmem %s140_s6, 128  ;;  %p208_p3 = scmp.lt.s32.totalorder %s140_s6, %s140_s6 }
  0x2a   :  { %v79_v7 = vsel %vm77_vm6, 30.0, %v235_v6  ;;  %v80_v8 = vsel %vm78_vm7, 30.0, %v235_v6  ;;  %p204_p2 = scmp.ne.s32.totalorder %s140_s6, %s203_s7  ;;  %p209_p4 = scmp.lt.s32.totalorder %s203_s7, %s203_s7 }
  0x2b   :  { %v81_v9 = vsel %vm75_vm4, 10.0, %v79_v7  ;;  %v82_v10 = vsel %vm76_vm5, 10.0, %v80_v8  ;;  %v91_v11 = vand.u32 2147483647, %v89_v4  ;;  %v92_v12 = vand.u32 2147483647, %v90_v5 }
  0x2c   :  { %v83_v13 = vsel %vm73_vm2, 5.0, %v81_v9  ;;  %v84_v14 = vsel %vm74_vm3, 5.0, %v82_v10  ;;  %p210_p5 = por %p209_p4, %p208_p3 }
  0x2d   :  { %v85_v15 = vsel %vm71_vm8, 2.0, %v83_v13  ;;  %v86_v16 = vsel %vm72_vm9, 2.0, %v84_v14 }
  0x2e   :  { %v87_v17 = vsel %vm69_vm0, 1.0, %v85_v15  ;;  %v88_v18 = vsel %vm70_vm1, 1.0, %v86_v16  ;;  %p211_p6 = pnand %p210_p5, %p204_p2 }
  0x2f   :  { %v93_v19 = vmul.f32 %v91_v11, %v87_v17  ;;  %v94_v20 = vmul.f32 %v92_v12, %v88_v18 }
  0x31   :  { %v104_v21 = vadd.f32 %v94_v20, %v93_v19 }
  0x33   :  { %132 = vst [vmem:[#allocation8] sm:$0xff] %v104_v21 }
  0x34   :  { %214 = shalt.err (!%p211_p6)
}
  0x35   :  { %s215_s10 = scalar_lea.hbm %s294_s2, 128 }
  0x36   :  { %p216_p7 = scmp.ne.s32.totalorder %s294_s2, %s215_s10  ;;  %p219_p8 = scmp.lt.u32.totalorder %s215_s10, %s294_s2 }
  0x38   :  { %p221_p9 = pnand %p219_p8, %p216_p7 }
  0x3a   :  { %224 = shalt.err (!%p221_p9)
}
  0x3b   :  { %142 = dma.vmem_to_hbm [thread:$0]  %s140_s6, 128, %s294_s2, [#allocation5]  }
  0x3c   :  { %229 = dma.done.wait [#allocation5], 128  }
  0x3d   :  { %230 = vsyncadd [#allocation5], 4294967168 }
  0x3e   :  { %146 = vsyncpa [#allocation4], 1 }
  0x3f   :  { %147 = vsyncpa [#allocation7], 1 }
  0x40   :  { %148 = vsyncpa [#allocation5], 1 }

</bundles_post_ra>
